<compile_context>
chip_gen: v6e
topology: v6e:2x2x1
jax: 0.10.0
libtpu: 0.0.40
codegen_flags: <defaults>
</compile_context>

<pallas_src>
import jax
import jax.numpy as jnp
from jax.experimental import pallas as pl
from jax.experimental.pallas import tpu as pltpu


def _round_up(x: int, m: int) -> int:
    return ((x + m - 1) // m) * m


def _make_ce_label_smooth_kernel(num_classes: int, epsilon: float,
                                 batch_size: int, tile_rows: int):
    keep = 1.0 - float(epsilon)
    smooth = float(epsilon) / float(num_classes)

    def kernel(x_ref, t_ref, out_ref):
        # x_ref: (TB, K) logits (native dtype) in VMEM; t_ref: (TB, 1) int32 labels.
        x = x_ref[...].astype(jnp.float32)                       # cast AFTER load
        t = t_ref[...]                                           # (TB, 1) int32
        tb, k = x.shape

        # Numerically-stable logsumexp along the class axis.
        m = jnp.max(x, axis=1, keepdims=True)                    # (TB, 1)
        z = x - m                                                # (TB, K)
        lse = jnp.log(jnp.sum(jnp.exp(z), axis=1, keepdims=True))  # (TB, 1)

        # sum_j logp[i, j] = sum_j z_ij - K * lse_i
        sum_logp = jnp.sum(z, axis=1, keepdims=True) - float(k) * lse   # (TB, 1)

        # logp[i, t_i] via iota-compare + where + lane-sum (no one-hot matrix).
        class_ids = jax.lax.broadcasted_iota(jnp.int32, (tb, k), 1)
        z_at_t = jnp.sum(jnp.where(class_ids == t, z, 0.0), axis=1, keepdims=True)
        logp_at_t = z_at_t - lse                                         # (TB, 1)

        # Per-row smoothed CE loss.
        row_loss = -(keep * logp_at_t + smooth * sum_logp)               # (TB, 1)

        # Mask rows belonging to batch padding (B padded up to a multiple of TB).
        row_ids = (pl.program_id(0) * tile_rows
                   + jax.lax.broadcasted_iota(jnp.int32, (tb, 1), 0))
        row_loss = jnp.where(row_ids < batch_size, row_loss, 0.0)

        # Per-tile partial sum, broadcast into a lane-aligned (1, 8, 128) block.
        partial = jnp.sum(row_loss)
        out_ref[...] = jnp.full(out_ref.shape, partial, dtype=jnp.float32)

    return kernel


def cross_entropy_label_smooth(inputs, targets, *, epsilon: float = 0.1,
                               tile_bytes: int = 8 * 1024 * 1024):
    """inputs: (B, K) float logits (any float dtype); targets: (B,) int labels -> scalar loss."""
    B, K = inputs.shape
    itemsize = jnp.dtype(inputs.dtype).itemsize

    # Batch tile: largest multiple of 8 whose logits slab is ~<= tile_bytes,
    # capped at 1024 rows and at the (8-aligned) batch size.
    rows_fit = max(8, ((tile_bytes // max(1, K * itemsize)) // 8) * 8)
    tb = min(rows_fit, 1024, _round_up(B, 8))
    b_pad = _round_up(B, tb)
    n_tiles = b_pad // tb

    if b_pad != B:
        inputs = jnp.pad(inputs, ((0, b_pad - B), (0, 0)))
        targets = jnp.pad(targets, (0, b_pad - B))
    targets_2d = targets.astype(jnp.int32).reshape(b_pad, 1)

    kernel = _make_ce_label_smooth_kernel(
        num_classes=K, epsilon=epsilon, batch_size=B, tile_rows=tb)

    partials = pl.pallas_call(
        kernel,
        out_shape=jax.ShapeDtypeStruct((n_tiles, 8, 128), jnp.float32),
        grid=(n_tiles,),
        in_specs=[
            pl.BlockSpec((tb, K), lambda i: (i, 0)),   # logits, native dtype
            pl.BlockSpec((tb, 1), lambda i: (i, 0)),   # labels (TB, 1) int32
        ],
        out_specs=pl.BlockSpec((1, 8, 128), lambda i: (i, 0, 0)),
        compiler_params=pltpu.CompilerParams(
            dimension_semantics=("parallel",),
            vmem_limit_bytes=32 * 1024 * 1024,
        ),
    )(inputs, targets_2d)

    # Final tiny reduction + global mean-over-batch scale in the wrapper.
    return jnp.sum(partials[:, 0, 0]) * (1.0 / B)


def _reference_loss(inputs, targets, epsilon=0.1):
    """Pure-JAX reference mirroring the PyTorch forward."""
    K = inputs.shape[1]
    log_probs = jax.nn.log_softmax(inputs.astype(jnp.float32), axis=1)
    one_hot = jax.nn.one_hot(targets, K, dtype=jnp.float32)
    smoothed = (1.0 - epsilon) * one_hot + epsilon / K
    return jnp.sum(jnp.mean(-smoothed * log_probs, axis=0))


if __name__ == "__main__":
    key = jax.random.PRNGKey(0)

    # Test 1: small f32, batch divisible by 8.
    k1, k2, key = jax.random.split(key, 3)
    B, K = 8, 16
    logits = jax.random.normal(k1, (B, K), dtype=jnp.float32)
    labels = jax.random.randint(k2, (B,), 0, K, dtype=jnp.int32)
    loss = jax.block_until_ready(cross_entropy_label_smooth(logits, labels, epsilon=0.1))
    ref = _reference_loss(logits, labels, epsilon=0.1)
    assert jnp.allclose(loss, ref, atol=1e-5, rtol=1e-5), (loss, ref)

    # Test 2: ragged batch (exercises padding + in-kernel row masking).
    k1, k2, key = jax.random.split(key, 3)
    B, K = 12, 24
    logits = jax.random.normal(k1, (B, K), dtype=jnp.float32)
    labels = jax.random.randint(k2, (B,), 0, K, dtype=jnp.int32)
    loss = jax.block_until_ready(cross_entropy_label_smooth(logits, labels, epsilon=0.1))
    ref = _reference_loss(logits, labels, epsilon=0.1)
    assert jnp.allclose(loss, ref, atol=1e-5, rtol=1e-5), (loss, ref)

    # Test 3: bf16 logits shipped over HBM in bf16, cast to f32 inside the kernel.
    k1, k2, key = jax.random.split(key, 3)
    B, K = 16, 256
    logits = jax.random.normal(k1, (B, K), dtype=jnp.float32).astype(jnp.bfloat16)
    labels = jax.random.randint(k2, (B,), 0, K, dtype=jnp.int32)
    loss = jax.block_until_ready(cross_entropy_label_smooth(logits, labels, epsilon=0.1))
    ref = _reference_loss(logits, labels, epsilon=0.1)   # ref sees the same bf16 values
    assert jnp.allclose(loss, ref, atol=1e-4, rtol=1e-4), (loss, ref)

    print("KERNEL_OK")
</pallas_src>

<mosaic_0001>
module attributes {stable_mosaic.version = 11 : i64} {
  func.func @kernel(%arg0: i32, %arg1: memref<8x16xf32, #tpu.memory_space<vmem>>, %arg2: memref<8x1xi32, #tpu.memory_space<vmem>>, %arg3: memref<1x8x128xf32, #tpu.memory_space<vmem>>) attributes {dimension_semantics = [#tpu.dimension_semantics<parallel>], iteration_bounds = array<i64: 1>, scalar_prefetch = 0 : i64, scratch_operands = 0 : i64, tpu.core_type = #tpu.core_type<tc>, window_params = [{transform_indices = @transform_0, window_bounds = array<i64: 8, 16>}, {transform_indices = @transform_1, window_bounds = array<i64: 8, 1>}, {transform_indices = @transform_2, window_bounds = array<i64: 1, 8, 128>}]} {
    %c0 = arith.constant 0 : index
    %c0_0 = arith.constant 0 : index
    %0 = vector.load %arg1[%c0, %c0_0] : memref<8x16xf32, #tpu.memory_space<vmem>>, vector<8x16xf32>
    %c0_1 = arith.constant 0 : index
    %c0_2 = arith.constant 0 : index
    %1 = vector.load %arg2[%c0_1, %c0_2] : memref<8x1xi32, #tpu.memory_space<vmem>>, vector<8x1xi32>
    %cst = arith.constant dense<0xFF800000> : vector<8xf32>
    %2 = vector.multi_reduction <maximumf>, %0, %cst [1] : vector<8x16xf32> to vector<8xf32>
    %3 = vector.shape_cast %2 : vector<8xf32> to vector<8x1xf32>
    %4 = vector.broadcast %3 : vector<8x1xf32> to vector<8x16xf32>
    %5 = arith.subf %0, %4 : vector<8x16xf32>
    %6 = math.exp %5 : vector<8x16xf32>
    %cst_3 = arith.constant dense<0.000000e+00> : vector<8xf32>
    %7 = vector.multi_reduction <add>, %6, %cst_3 [1] : vector<8x16xf32> to vector<8xf32>
    %8 = vector.shape_cast %7 : vector<8xf32> to vector<8x1xf32>
    %9 = math.log %8 : vector<8x1xf32>
    %cst_4 = arith.constant dense<0.000000e+00> : vector<8xf32>
    %10 = vector.multi_reduction <add>, %5, %cst_4 [1] : vector<8x16xf32> to vector<8xf32>
    %11 = vector.shape_cast %10 : vector<8xf32> to vector<8x1xf32>
    %cst_5 = arith.constant 1.600000e+01 : f32
    %12 = vector.broadcast %cst_5 : f32 to vector<8x1xf32>
    %13 = arith.mulf %12, %9 : vector<8x1xf32>
    %14 = arith.subf %11, %13 : vector<8x1xf32>
    %15 = tpu.iota {dimensions = array<i32: 1>} : vector<8x16xi32>
    %16 = vector.broadcast %1 : vector<8x1xi32> to vector<8x16xi32>
    %17 = arith.cmpi eq, %15, %16 : vector<8x16xi32>
    %cst_6 = arith.constant 0.000000e+00 : f32
    %18 = vector.broadcast %cst_6 : f32 to vector<8x16xf32>
    %19 = arith.select %17, %5, %18 : vector<8x16xi1>, vector<8x16xf32>
    %cst_7 = arith.constant dense<0.000000e+00> : vector<8xf32>
    %20 = vector.multi_reduction <add>, %19, %cst_7 [1] : vector<8x16xf32> to vector<8xf32>
    %21 = vector.shape_cast %20 : vector<8xf32> to vector<8x1xf32>
    %22 = arith.subf %21, %9 : vector<8x1xf32>
    %cst_8 = arith.constant 0.899999976 : f32
    %23 = vector.broadcast %cst_8 : f32 to vector<8x1xf32>
    %24 = arith.mulf %23, %22 : vector<8x1xf32>
    %cst_9 = arith.constant 6.250000e-03 : f32
    %25 = vector.broadcast %cst_9 : f32 to vector<8x1xf32>
    %26 = arith.mulf %25, %14 : vector<8x1xf32>
    %27 = arith.addf %24, %26 : vector<8x1xf32>
    %cst_10 = arith.constant 0.000000e+00 : f32
    %28 = vector.broadcast %cst_10 : f32 to vector<8x1xf32>
    %29 = arith.subf %28, %27 : vector<8x1xf32>
    %c8_i32 = arith.constant 8 : i32
    %30 = arith.muli %arg0, %c8_i32 : i32
    %31 = tpu.iota {dimensions = array<i32: 0>} : vector<8x1xi32>
    %32 = vector.broadcast %30 : i32 to vector<8x1xi32>
    %33 = arith.addi %32, %31 : vector<8x1xi32>
    %c8_i32_11 = arith.constant 8 : i32
    %34 = vector.broadcast %c8_i32_11 : i32 to vector<8x1xi32>
    %35 = arith.cmpi slt, %33, %34 : vector<8x1xi32>
    %cst_12 = arith.constant 0.000000e+00 : f32
    %36 = vector.broadcast %cst_12 : f32 to vector<8x1xf32>
    %37 = arith.select %35, %29, %36 : vector<8x1xi1>, vector<8x1xf32>
    %38 = vector.shape_cast %37 : vector<8x1xf32> to vector<1x8x1xf32>
    %cst_13 = arith.constant dense<0.000000e+00> : vector<1xf32>
    %39 = vector.multi_reduction <add>, %38, %cst_13 [1, 2] : vector<1x8x1xf32> to vector<1xf32>
    %40 = vector.shape_cast %39 : vector<1xf32> to vector<1x1x1xf32>
    %41 = vector.extract %40[0, 0, 0] : f32 from vector<1x1x1xf32>
    %42 = vector.broadcast %41 : f32 to vector<1x8x128xf32>
    %c0_14 = arith.constant 0 : index
    %c0_15 = arith.constant 0 : index
    %c0_16 = arith.constant 0 : index
    %43 = vector.load %arg3[%c0_14, %c0_15, %c0_16] : memref<1x8x128xf32, #tpu.memory_space<vmem>>, vector<1x8x128xf32>
    tpu.vector_store %arg3[%c0_14, %c0_15, %c0_16], %42 {strides = array<i32>} : memref<1x8x128xf32, #tpu.memory_space<vmem>>, vector<1x8x128xf32>,
    return
  }
  func.func @transform_0(%arg0: i32) -> (i32, i32) {
    %c0_i32 = arith.constant 0 : i32
    %c0_i32_0 = arith.constant 0 : i32
    return %arg0, %c0_i32 : i32, i32
  }
  func.func @transform_1(%arg0: i32) -> (i32, i32) {
    %c0_i32 = arith.constant 0 : i32
    %c0_i32_0 = arith.constant 0 : i32
    return %arg0, %c0_i32 : i32, i32
  }
  func.func @transform_2(%arg0: i32) -> (i32, i32, i32) {
    %c0_i32 = arith.constant 0 : i32
    %c0_i32_0 = arith.constant 0 : i32
    %c0_i32_1 = arith.constant 0 : i32
    return %arg0, %c0_i32, %c0_i32_0 : i32, i32, i32
  }
}

</mosaic_0001>

<bundles_post_ra>
// kernel: tpu_custom_call.1
= control target key start
LH: loop header
LB: loop body
LE: loop exit
PB: predicated region body
PF: predicated region fallthrough
CT: control target
= control target key end

     0   :  { %vm14_vm0 = vcmask 130048   ;;  %s141_s0 = inlined_call_operand.vmem [shape: f32[8,16], index: 0, kind: input, shape index: {}]   ;;  %s142_s1 = inlined_call_operand.vmem [shape: s32[8,1], index: 1, kind: input, shape index: {}]   ;;  %s143_s2 = inlined_call_operand.hbm [shape: f32[1,8,128], index: 2, kind: output, shape index: {}]  }
   0x1   :  { %v12_v0 = vld [vmem:[%s141_s0] sm:$0xff] }
   0x2   :  { %7 = vsyncpa [#allocation3], 0  ;;  %v15_v1 = vsel %vm14_vm0, %v12_v0, -inf  ;;  %v111_v2 = vmov 0   ;;  %v13_v3 = vld [vmem:[%s142_s1] sm:$0xff]  ;;  %v31_v7 = vlaneseq  ;;  %vm53_vm2 = vcmask 7168  }
   0x3   :  { %84 = vset.pattern.permute.xlu0 %v111_v2  ;;  %s112_s0 = smov [#allocation2]  }
   0x4   :  { %16 = vmax.xlane.f32.xlu0 %v15_v1  ;;  %v32_v8 = vand.u32 127, %v31_v7  ;;  %s72_s1 = sshll.u32 %s112_s0, 4  ;;  %s73_s1 = int_to_ptr.vmem [resolvable:$true] %s72_s1 }
   0x5   :  { %s89_s14 = scalar_lea.vmem %s73_s1, 128  ;;  %p94_p1 = scmp.lt.s32.totalorder %s73_s1, %s73_s1 }
   0x6   :  { %p90_p0 = scmp.ne.s32.totalorder %s73_s1, %s89_s14  ;;  %p95_p2 = scmp.lt.s32.totalorder %s89_s14, %s89_s14 }
   0x8   :  { %p96_p3 = por %p95_p2, %p94_p1 }
   0xa   :  { %p97_p4 = pnand %p96_p3, %p90_p0 }
  0x1a   :  { %34 = vperm.xlu0 %84, %v13_v3  }
  0x8d   :  { %v17_v4 = vpop.xlane.xlu0 %16 }
  0x8e   :  { %v18_v5 = vsub.f32 %v12_v0, %v17_v4 }
  0x90   :  { %v19_v6 = vmul.f32 1.442695, %v18_v5  ;;  %v26_v12 = vsel %vm14_vm0, %v18_v5, 0.0 }
  0x92   :  { %85 = vpow2.f32 %v19_v6 }
  0x95   :  { %v35_v10 = vpop.permute.xlu0 %34 }
  0x96   :  { %vm36_vm1 = vcmp.eq.s32.totalorder %v32_v8, %v35_v10 }
  0x97   :  { %v37_v13 = vsel %vm36_vm1, %v18_v5, 0.0 }
  0x98   :  { %v38_v14 = vsel %vm14_vm0, %v37_v13, 0.0 }
  0x9f   :  { %v86_v9 = vpop.eup %85 }
  0xa0   :  { %v21_v11 = vsel %vm14_vm0, %v86_v9, 0.0 }
  0xa1   :  { %22 = vadd.xlane.f32.xlu1 %v21_v11 }
  0xa5   :  { %27 = vadd.xlane.f32.xlu1 %v26_v12 }
  0xa9   :  { %39 = vadd.xlane.f32.xlu1 %v38_v14 }
 0x12a   :  { %v23_v15 = vpop.xlane.xlu1 %22 }
 0x12b   :  { %87 = vlog2.f32 %v23_v15 }
 0x12e   :  { %v28_v16 = vpop.xlane.xlu1 %27 }
 0x132   :  { %v40_v19 = vpop.xlane.xlu1 %39 }
 0x138   :  { %v88_v17 = vpop.eup %87 }
 0x139   :  { %v25_v18 = vmul.f32 0.6931472, %v88_v17 }
 0x13b   :  { %v29_v20 = vmul.f32 16.0, %v25_v18  ;;  %v41_v21 = vsub.f32 %v40_v19, %v25_v18 }
 0x13d   :  { %v30_v22 = vsub.f32 %v28_v16, %v29_v20  ;;  %v42_v24 = vmul.f32 0.9, %v41_v21 }
 0x13f   :  { %v43_v23 = vmul.f32 0.00625, %v30_v22 }
 0x141   :  { %v44_v25 = vadd.f32 %v43_v23, %v42_v24 }
 0x143   :  { %v45_v26 = vsub.f32 0.0, %v44_v25 }
 0x145   :  { %v54_v27 = vsel %vm53_vm2, %v45_v26, 0.0 }
 0x146   :  { %55 = vadd.xlane.f32.xlu1 %v54_v27 }
 0x1cf   :  { %v56_v28 = vpop.xlane.xlu1 %55 }
 0x1d0   :  { %v57_v29 = vrot.slane %v56_v28, 4 }
 0x1d2   :  { %v58_v30 = vadd.f32 %v57_v29, %v56_v28 }
 0x1d4   :  { %v59_v31 = vrot.slane %v58_v30, 2 }
 0x1d6   :  { %v60_v32 = vadd.f32 %v59_v31, %v58_v30 }
 0x1d8   :  { %v61_v33 = vrot.slane %v60_v32, 1 }
 0x1da   :  { %v62_v34 = vadd.f32 %v61_v33, %v60_v32 }
 0x1dc   :  { %80 = vpush %v62_v34 }
 0x20d   :  { %s81_s13 = spop %80 }
 0x20e   :  { %v64_v35 = vstv %s81_s13 }
 0x20f   :  { %65 = vst [vmem:[#allocation2] sm:$0xff] %v64_v35 }
 0x210   :  { %100 = shalt.err (!%p97_p4)
}
 0x211   :  { %75 = dma.vmem_to_hbm [thread:$0]  %s73_s1, 128, %s143_s2, [#allocation3]  }
 0x212   :  { %109 = dma.done.wait [#allocation3], 128  }
 0x213   :  { %110 = vsyncadd [#allocation3], 4294967168 }
 0x214   :  { %79 = vsyncpa [#allocation3], 1 }

</bundles_post_ra>
